<compile_context>
chip_gen: v7x
topology: tpu7x:2x2x1
jax: 0.10.0
libtpu: 0.0.40
codegen_flags: <defaults>
</compile_context>

<pallas_src>
import jax
import jax.numpy as jnp
from jax.experimental import pallas as pl
from jax.experimental.pallas import tpu as pltpu


def _round_up(x, m):
    return ((x + m - 1) // m) * m


def _num_tensorcores():
    """Best-effort TensorCores-per-chip query (2 on v7x, 1 on v5e/v6e)."""
    try:
        info = pltpu.get_tpu_info()
        for attr in ("tensorcores_per_chip", "num_tensorcores", "num_cores",
                     "cores_per_chip"):
            n = getattr(info, attr, None)
            if isinstance(n, int) and n > 0:
                return n
    except Exception:
        pass
    try:
        if "v7" in jax.devices()[0].device_kind.lower():
            return 2
    except Exception:
        pass
    return 1


# ------------------------------ Pallas kernel ------------------------------ #
def _dueling_head_kernel(x_ref, w1_ref, w2_ref, out_ref):
    # Hidden layer (both streams + layer-1 bias via the ones column), ReLU.
    h = jnp.maximum(
        jnp.dot(x_ref[...], w1_ref[...], preferred_element_type=jnp.float32), 0.0)
    # Second layer + full dueling combine + layer-2 bias (pinned-ones hidden
    # unit), all pre-folded into w2_ref.  Lane-dense store.
    out_ref[...] = jnp.dot(
        h, w2_ref[...], preferred_element_type=jnp.float32).astype(out_ref.dtype)


# --------------------------------- wrapper ---------------------------------- #
def dueling_head_forward(x, packed, *, output_size, n_atoms, tile_b=512,
                         operand_dtype=None):
    B, in_size = x.shape
    w1, w2 = packed["w1"], packed["w2"]
    in_aug, oa, oa_pad = packed["in_aug"], packed["oa"], packed["oa_pad"]
    h_pad = w1.shape[1]
    assert in_aug == in_size + 1

    # Generation-aware batch tiling: minimize padding; 1 step on 1-TC chips
    # (v5e/v6e), >= 2 balanced tiles on v7x so both TensorCores get work.
    n_cores = _num_tensorcores()
    bytes_per_row = 4 * (in_aug + oa_pad) * 2        # x + out tiles, double-buffered
    tb_vmem_cap = max(8, ((8 * 1024 * 1024) // bytes_per_row) // 8 * 8)
    tile_b = min(tile_b, tb_vmem_cap)
    n_tiles = max(n_cores, pl.cdiv(B, tile_b))
    tb = _round_up(pl.cdiv(B, n_tiles), 8)
    grid_b = pl.cdiv(B, tb)
    b_pad = grid_b * tb

    # Augment x with the ones column (bias fold).  With the tile selection
    # above b_pad == B on 1-TC chips, so this is the only wrapper-side copy.
    x_body = jnp.pad(x, ((0, b_pad - B), (0, 0))) if b_pad != B else x
    x_in = jnp.concatenate(
        [x_body, jnp.ones((b_pad, 1), x_body.dtype)], axis=1)

    if operand_dtype is not None:
        # bf16 operands once the head is HBM/MXU-bound at production batch
        # sizes; accumulation stays f32 via preferred_element_type.
        x_in = x_in.astype(operand_dtype)
        w1 = w1.astype(operand_dtype)
        w2 = w2.astype(operand_dtype)

    cost = pl.CostEstimate(
        flops=2 * b_pad * (in_aug * h_pad + h_pad * oa_pad),
        transcendentals=0,
        bytes_accessed=(x_in.size * x_in.dtype.itemsize
                        + w1.size * w1.dtype.itemsize
                        + w2.size * w2.dtype.itemsize
                        + b_pad * oa_pad * 4),
    )

    def full_block(a):
        # Tiny parameter slab: fully resident in VMEM at every grid step.
        return pl.BlockSpec(a.shape, lambda i: (0,) * a.ndim)

    out_flat = pl.pallas_call(
        _dueling_head_kernel,
        out_shape=jax.ShapeDtypeStruct((b_pad, oa_pad), jnp.float32),
        grid=(grid_b,),
        in_specs=[
            pl.BlockSpec((tb, in_aug), lambda i: (i, 0)),   # x tiled over batch
            full_block(w1),
            full_block(w2),
        ],
        out_specs=pl.BlockSpec((tb, oa_pad), lambda i: (i, 0)),
        compiler_params=pltpu.CompilerParams(
            dimension_semantics=("parallel",)),
        cost_estimate=cost,
    )(x_in, w1, w2)

    return out_flat[:B, :oa].reshape(B, output_size, n_atoms)


# ----------------------- parameter packing (one-time) ----------------------- #
def pack_params(params, *, output_size, n_atoms):
    """Fold the dueling head into two dense layers (exact, linear algebra only).

    out_flat = [x | 1] @ W1_full   -> relu -> @ W2_full
    W1_full absorbs both hidden layers + biases (ones-column row) and pins one
    extra hidden unit to 1; W2_full absorbs advantage_out, the value out layer,
    advantage_bias, b2v, the mean-over-actions subtraction and the value
    broadcast (its pinned-ones row is the folded output bias).
    """
    o, a = output_size, n_atoms
    oa = o * a
    in_size, hidden = params["w1a"].shape
    h2 = 2 * hidden

    # Fused hidden layer: [advantage | value].
    w1 = jnp.concatenate([params["w1a"], params["w1v"]], axis=1)    # (in, 2H)
    b1 = jnp.concatenate([params["b1a"], params["b1v"]], axis=1)    # (1, 2H)

    # Block-diagonal second layer producing y = [adv_flat + adv_bias | val].
    w2 = jnp.zeros((h2, oa + a), jnp.float32)
    w2 = w2.at[:hidden, :oa].set(params["w2a"])
    w2 = w2.at[hidden:, oa:].set(params["w2v"])
    b2 = jnp.concatenate(
        [jnp.tile(params["adv_bias"], (1, o)), params["b2v"]], axis=1)  # (1, oa+A)

    # Combine matrix E: out[:, o*A+a] = y_adv[:, o*A+a]
    #                                   - mean_{o'} y_adv[:, o'*A+a] + y_val[:, a]
    # NOTE: a per-atom constant advantage_bias is annihilated by the mean
    # subtraction (E maps it to itself minus its own mean = 0), exactly as in
    # the reference; it is still carried through b2 @ E so the fold stays exact
    # if the bias ever becomes action-dependent.
    eye_a = jnp.eye(a, dtype=jnp.float32)
    e_adv = jnp.eye(oa, dtype=jnp.float32) - jnp.tile(eye_a, (o, o)) / o   # (oa, oa)
    e_val = jnp.tile(eye_a, (1, o))                                         # (A, oa)
    e = jnp.concatenate([e_adv, e_val], axis=0)                             # (oa+A, oa)

    w2e = w2 @ e                                                            # (2H, oa)
    b2e = b2 @ e                                                            # (1, oa)

    # Bias folding + lane-dense padding (multiples of 128 -> unmasked stores).
    in_aug = in_size + 1          # trailing ones column in x
    h_dim = h2 + 1                # +1 pinned-ones hidden unit
    h_pad = _round_up(h_dim, 128)
    oa_pad = _round_up(oa, 128)

    w1_full = jnp.zeros((in_aug, h_pad), jnp.float32)
    w1_full = w1_full.at[:in_size, :h2].set(w1)
    w1_full = w1_full.at[in_size, :h2].set(b1[0])      # layer-1 bias row
    w1_full = w1_full.at[in_size, h2].set(1.0)         # pinned-ones hidden unit

    w2_full = jnp.zeros((h_pad, oa_pad), jnp.float32)
    w2_full = w2_full.at[:h2, :oa].set(w2e)
    w2_full = w2_full.at[h2, :oa].set(b2e[0])          # folded output bias row

    return dict(w1=w1_full, w2=w2_full, in_aug=in_aug, oa=oa, oa_pad=oa_pad)


# ----------------------------- parameter init ------------------------------- #
def init_params(key, input_size, hidden, output_size, n_atoms):
    """Deterministic synthetic weights (PyTorch Linear-style uniform init).

    Weights stored transposed, i.e. (in_features, out_features), so x @ W
    equals torch's x @ weight.T.
    """
    ks = jax.random.split(key, 7)

    def unif(k, shape, fan_in):
        bound = 1.0 / jnp.sqrt(jnp.float32(fan_in))
        return jax.random.uniform(k, shape, jnp.float32, -bound, bound)

    return dict(
        # advantage_hidden: Linear(input_size -> hidden) + ReLU
        w1a=unif(ks[0], (input_size, hidden), input_size),
        b1a=unif(ks[1], (1, hidden), input_size),
        # advantage_out: Linear(hidden -> output_size * n_atoms), bias=False
        w2a=unif(ks[2], (hidden, output_size * n_atoms), hidden),
        # advantage_bias: Parameter(zeros(n_atoms))
        adv_bias=jnp.zeros((1, n_atoms), jnp.float32),
        # value: Linear(input_size -> hidden) + ReLU, Linear(hidden -> n_atoms)
        w1v=unif(ks[3], (input_size, hidden), input_size),
        b1v=unif(ks[4], (1, hidden), input_size),
        w2v=unif(ks[5], (hidden, n_atoms), hidden),
        b2v=unif(ks[6], (1, n_atoms), hidden),
    )


# ---------------------------- pure-JAX reference ---------------------------- #
def reference_forward(x, params, *, output_size, n_atoms):
    # TODO(synk): scale_grad only rescales gradients; forward is identity, so it
    # is intentionally omitted here.
    ha = jnp.maximum(x @ params["w1a"] + params["b1a"], 0.0)
    adv = (ha @ params["w2a"]).reshape(-1, output_size, n_atoms)
    adv = adv + params["adv_bias"].reshape(1, 1, n_atoms)
    hv = jnp.maximum(x @ params["w1v"] + params["b1v"], 0.0)
    val = (hv @ params["w2v"] + params["b2v"]).reshape(-1, 1, n_atoms)
    return val + (adv - adv.mean(axis=1, keepdims=True))


# ----------------------------------- main ----------------------------------- #
if __name__ == "__main__":
    B, INPUT_SIZE, HIDDEN, OUTPUT_SIZE, N_ATOMS = 200, 64, 32, 4, 16

    key = jax.random.PRNGKey(0)
    kx, kp = jax.random.split(key)
    x = jax.random.normal(kx, (B, INPUT_SIZE), jnp.float32)
    params = init_params(kp, INPUT_SIZE, HIDDEN, OUTPUT_SIZE, N_ATOMS)
    packed = pack_params(params, output_size=OUTPUT_SIZE, n_atoms=N_ATOMS)

    q = dueling_head_forward(x, packed, output_size=OUTPUT_SIZE,
                             n_atoms=N_ATOMS, tile_b=512)
    q = jax.block_until_ready(q)

    q_ref = reference_forward(x, params, output_size=OUTPUT_SIZE, n_atoms=N_ATOMS)
    assert q.shape == (B, OUTPUT_SIZE, N_ATOMS)
    assert jnp.allclose(q, q_ref, atol=1e-4, rtol=1e-4), "mismatch vs reference"

    print("KERNEL_OK")
</pallas_src>

<mosaic_0001>
module attributes {stable_mosaic.version = 11 : i64} {
  func.func @_dueling_head_kernel(%arg0: i32, %arg1: memref<200x65xf32, #tpu.memory_space<vmem>>, %arg2: memref<65x128xf32, #tpu.memory_space<vmem>>, %arg3: memref<128x128xf32, #tpu.memory_space<vmem>>, %arg4: memref<200x128xf32, #tpu.memory_space<vmem>>) attributes {dimension_semantics = [#tpu.dimension_semantics<parallel>], iteration_bounds = array<i64: 1>, scalar_prefetch = 0 : i64, scratch_operands = 0 : i64, tpu.core_type = #tpu.core_type<tc>, window_params = [{transform_indices = @transform_0, window_bounds = array<i64: 200, 65>}, {pipeline_mode = #tpu.pipeline_mode<synchronous>, transform_indices = @transform_1, window_bounds = array<i64: 65, 128>}, {pipeline_mode = #tpu.pipeline_mode<synchronous>, transform_indices = @transform_2, window_bounds = array<i64: 128, 128>}, {transform_indices = @transform_3, window_bounds = array<i64: 200, 128>}]} {
    %c0 = arith.constant 0 : index
    %c0_0 = arith.constant 0 : index
    %0 = vector.load %arg1[%c0, %c0_0] : memref<200x65xf32, #tpu.memory_space<vmem>>, vector<200x65xf32>
    %c0_1 = arith.constant 0 : index
    %c0_2 = arith.constant 0 : index
    %1 = vector.load %arg2[%c0_1, %c0_2] : memref<65x128xf32, #tpu.memory_space<vmem>>, vector<65x128xf32>
    %cst = arith.constant dense<0.000000e+00> : vector<200x128xf32>
    %2 = tpu.matmul %0, %1, %cst {dimension_numbers = #tpu.dot_dimension_numbers<[1], [0], [0], [1], [0, 0, 1, 1], [], []>} : vector<200x65xf32>, vector<65x128xf32>, vector<200x128xf32> -> vector<200x128xf32>
    %cst_3 = arith.constant 0.000000e+00 : f32
    %3 = vector.broadcast %cst_3 : f32 to vector<200x128xf32>
    %4 = arith.maximumf %2, %3 : vector<200x128xf32>
    %c0_4 = arith.constant 0 : index
    %c0_5 = arith.constant 0 : index
    %5 = vector.load %arg3[%c0_4, %c0_5] : memref<128x128xf32, #tpu.memory_space<vmem>>, vector<128x128xf32>
    %cst_6 = arith.constant dense<0.000000e+00> : vector<200x128xf32>
    %6 = tpu.matmul %4, %5, %cst_6 {dimension_numbers = #tpu.dot_dimension_numbers<[1], [0], [0], [1], [0, 0, 1, 1], [], []>} : vector<200x128xf32>, vector<128x128xf32>, vector<200x128xf32> -> vector<200x128xf32>
    %c0_7 = arith.constant 0 : index
    %c0_8 = arith.constant 0 : index
    %7 = vector.load %arg4[%c0_7, %c0_8] : memref<200x128xf32, #tpu.memory_space<vmem>>, vector<200x128xf32>
    tpu.vector_store %arg4[%c0_7, %c0_8], %6 {strides = array<i32>} : memref<200x128xf32, #tpu.memory_space<vmem>>, vector<200x128xf32>,
    return
  }
  func.func @transform_0(%arg0: i32) -> (i32, i32) {
    %c0_i32 = arith.constant 0 : i32
    %c0_i32_0 = arith.constant 0 : i32
    return %arg0, %c0_i32 : i32, i32
  }
  func.func @transform_1(%arg0: i32) -> (i32, i32) {
    %c0_i32 = arith.constant 0 : i32
    %c0_i32_0 = arith.constant 0 : i32
    %c0_i32_1 = arith.constant 0 : i32
    return %c0_i32, %c0_i32_0 : i32, i32
  }
  func.func @transform_2(%arg0: i32) -> (i32, i32) {
    %c0_i32 = arith.constant 0 : i32
    %c0_i32_0 = arith.constant 0 : i32
    %c0_i32_1 = arith.constant 0 : i32
    return %c0_i32, %c0_i32_0 : i32, i32
  }
  func.func @transform_3(%arg0: i32) -> (i32, i32) {
    %c0_i32 = arith.constant 0 : i32
    %c0_i32_0 = arith.constant 0 : i32
    return %arg0, %c0_i32 : i32, i32
  }
}

</mosaic_0001>

<bundles_post_ra>
// kernel: tpu_custom_call.1
= control target key start
LH: loop header
LB: loop body
LE: loop exit
PB: predicated region body
PF: predicated region fallthrough
CT: control target
= control target key end

     0   :  { %v974_v3 = vmov 0.0|0.0   ;;  %vm975_vm0 = vmmov 0   ;;  %v976_v6 = vmov 0.0   ;;  %vm125_vm1 = vcmask 1040384   ;;  %s1308_s0 = inlined_call_operand.vmem [shape: f32[200,65], index: 0, kind: input, shape index: {}]   ;;  %s1309_s1 = inlined_call_operand.vmem [shape: f32[65,128], index: 1, kind: input, shape index: {}]   ;;  %s1310_s2 = inlined_call_operand.vmem [shape: f32[128,128], index: 2, kind: input, shape index: {}]   ;;  %s1311_s3 = inlined_call_operand.hbm [shape: f32[200,128], index: 3, kind: output, shape index: {}]  }
   0x1   :  { %v40_v0 = vld [vmem:[%s1309_s1] sm:$0xff]  ;;  %v41_v1 = vld [vmem:[%s1309_s1 + $0x8] sm:$0xff]  ;;  %v42_v2 = vld [vmem:[%s1309_s1 + $0x10] sm:$0xff]  ;;  %892 = vmatprep.subr.bf16.mxu0 %v974_v3  ;;  %928 = vmatprep.subr.bf16.mxu1 %v974_v3 }
   0x2   :  { %v893_v4 = vpack.c.bf16 %v41_v1, %v40_v0  ;;  %v43_v5 = vld [vmem:[%s1309_s1 + $0x18] sm:$0xff]  ;;  %710 = vmatprep.mubr.msk.f32.mxu0 %vm975_vm0, %v976_v6  ;;  %820 = vmatprep.mubr.msk.f32.mxu1 %vm975_vm0, %v976_v6  ;;  %v44_v8 = vld [vmem:[%s1309_s1 + $0x20] sm:$0xff]  ;;  %v45_v9 = vld [vmem:[%s1309_s1 + $0x28] sm:$0xff] }
   0x3   :  { %v896_v7 = vpack.c.bf16 %v43_v5, %v42_v2  ;;  %v899_v10 = vpack.c.bf16 %v45_v9, %v44_v8  ;;  %v46_v11 = vld [vmem:[%s1309_s1 + $0x30] sm:$0xff]  ;;  %v47_v12 = vld [vmem:[%s1309_s1 + $0x38] sm:$0xff]  ;;  %v344_v14 = vld [vmem:[%s1310_s2] sm:$0xff] }
   0x4   :  { %894 = vmatpush3.bf16.msra.mxu0 %v893_v4  ;;  %v902_v13 = vpack.c.bf16 %v47_v12, %v46_v11  ;;  %v345_v15 = vld [vmem:[%s1310_s2 + $0x8] sm:$0xff]  ;;  %v346_v17 = vld [vmem:[%s1310_s2 + $0x10] sm:$0xff]  ;;  %v347_v18 = vld [vmem:[%s1310_s2 + $0x18] sm:$0xff] }
   0x5   :  { %895 = vmatprep.subr.bf16.mxu0 %v974_v3  ;;  %v905_v16 = vpack.c.bf16 %v345_v15, %v344_v14  ;;  %v48_v19 = vld [vmem:[%s1309_s1 + $0x40] sm:$0x1]  ;;  %v908_v20 = vpack.c.bf16 %v347_v18, %v346_v17 }
   0x7   :  { %936 = vmatpush3.bf16.msra.mxu1 %v905_v16 }
   0x8   :  { %897 = vmatpush3.bf16.msra.mxu0 %v896_v7  ;;  %929 = vmatprep.subr.bf16.mxu1 %v974_v3 }
   0x9   :  { %898 = vmatprep.subr.bf16.mxu0 %v974_v3 }
   0xc   :  { %900 = vmatpush3.bf16.msra.mxu0 %v899_v10 }
   0xd   :  { %901 = vmatprep.subr.bf16.mxu0 %v974_v3 }
  0x10   :  { %903 = vmatpush3.bf16.msra.mxu0 %v902_v13 }
  0x11   :  { %708 = vmatprep.subr.mxu0 %v976_v6 }
  0x12   :  { %8 = vsyncpa [#allocation3], 0  ;;  %v15_v21 = vld [vmem:[%s1308_s0] sm:$0xff]  ;;  %vm49_vm2 = vcmask 531456   ;;  %v349_v23 = vld [vmem:[%s1310_s2 + $0x28] sm:$0xff]  ;;  %937 = vmatpush3.bf16.msra.mxu1 %v908_v20 }
  0x13   :  { %v348_v22 = vld [vmem:[%s1310_s2 + $0x20] sm:$0xff]  ;;  %930 = vmatprep.subr.bf16.mxu1 %v974_v3  ;;  %v16_v25 = vld [vmem:[%s1308_s0 + $0x8] sm:$0xff]  ;;  %v350_v26 = vld [vmem:[%s1310_s2 + $0x30] sm:$0xff] }
  0x14   :  { %709 = vmatpush3.msk.msra.mxu0 %vm125_vm1, %v48_v19  ;;  %v911_v24 = vpack.c.bf16 %v349_v23, %v348_v22  ;;  %v351_v27 = vld [vmem:[%s1310_s2 + $0x38] sm:$0xff]  ;;  %v17_v29 = vld [vmem:[%s1308_s0 + $0x10] sm:$0xff]  ;;  %v352_v30 = vld [vmem:[%s1310_s2 + $0x40] sm:$0xff] }
  0x15   :  { %711 = vmatmul.mubr.msk.f32.vlgmr.msra.gmra.mrb[0].mxu0 %vm49_vm2, %v15_v21  ;;  %904 = vmatprep.subr.bf16.mxu0 %v974_v3  ;;  %v914_v28 = vpack.c.bf16 %v351_v27, %v350_v26  ;;  %v353_v31 = vld [vmem:[%s1310_s2 + $0x48] sm:$0xff]  ;;  %v18_v33 = vld [vmem:[%s1308_s0 + $0x18] sm:$0xff]  ;;  %v354_v34 = vld [vmem:[%s1310_s2 + $0x50] sm:$0xff] }
  0x16   :  { %713 = vmatprep.mubr.msk.f32.mxu0 %vm975_vm0, %v976_v6  ;;  %906 = vmatpush3.bf16.msra.mxu0 %v905_v16  ;;  %v917_v32 = vpack.c.bf16 %v353_v31, %v352_v30  ;;  %v355_v35 = vld [vmem:[%s1310_s2 + $0x58] sm:$0xff]  ;;  %v19_v37 = vld [vmem:[%s1308_s0 + $0x20] sm:$0xff]  ;;  %v357_v39 = vld [vmem:[%s1310_s2 + $0x68] sm:$0xff] }
  0x17   :  { %907 = vmatprep.subr.bf16.mxu0 %v974_v3  ;;  %938 = vmatpush3.bf16.msra.mxu1 %v911_v24  ;;  %v920_v36 = vpack.c.bf16 %v355_v35, %v354_v34  ;;  %v356_v38 = vld [vmem:[%s1310_s2 + $0x60] sm:$0xff]  ;;  %v20_v41 = vld [vmem:[%s1308_s0 + $0x28] sm:$0xff]  ;;  %v21_v42 = vld [vmem:[%s1308_s0 + $0x30] sm:$0xff] }
  0x18   :  { %931 = vmatprep.subr.bf16.mxu1 %v974_v3  ;;  %v923_v40 = vpack.c.bf16 %v357_v39, %v356_v38  ;;  %v22_v43 = vld [vmem:[%s1308_s0 + $0x38] sm:$0xff]  ;;  %v23_v44 = vld [vmem:[%s1308_s0 + $0x40] sm:$0xff]  ;;  %v24_v45 = vld [vmem:[%s1308_s0 + $0x48] sm:$0xff] }
  0x19   :  { %714 = vmatmul.mubr.msk.f32.gmra.mrb[2].mxu0 %vm49_vm2, %v16_v25  ;;  %v25_v46 = vld [vmem:[%s1308_s0 + $0x50] sm:$0xff]  ;;  %v26_v47 = vld [vmem:[%s1308_s0 + $0x58] sm:$0xff]  ;;  %v27_v48 = vld [vmem:[%s1308_s0 + $0x60] sm:$0xff] }
  0x1a   :  { %716 = vmatprep.mubr.msk.f32.mxu0 %vm975_vm0, %v976_v6  ;;  %909 = vmatpush3.bf16.msra.mxu0 %v908_v20  ;;  %v28_v49 = vld [vmem:[%s1308_s0 + $0x68] sm:$0xff]  ;;  %v29_v50 = vld [vmem:[%s1308_s0 + $0x70] sm:$0xff]  ;;  %v30_v51 = vld [vmem:[%s1308_s0 + $0x78] sm:$0xff] }
  0x1b   :  { %910 = vmatprep.subr.bf16.mxu0 %v974_v3  ;;  %939 = vmatpush3.bf16.msra.mxu1 %v914_v28  ;;  %v31_v52 = vld [vmem:[%s1308_s0 + $0x80] sm:$0xff]  ;;  %v32_v53 = vld [vmem:[%s1308_s0 + $0x88] sm:$0xff]  ;;  %v33_v54 = vld [vmem:[%s1308_s0 + $0x90] sm:$0xff] }
  0x1c   :  { %932 = vmatprep.subr.bf16.mxu1 %v974_v3  ;;  %v34_v55 = vld [vmem:[%s1308_s0 + $0x98] sm:$0xff]  ;;  %v35_v56 = vld [vmem:[%s1308_s0 + $0xa0] sm:$0xff]  ;;  %v358_v57 = vld [vmem:[%s1310_s2 + $0x70] sm:$0xff] }
  0x1d   :  { %717 = vmatmul.mubr.msk.f32.gmra.mrb[4].mxu0 %vm49_vm2, %v17_v29  ;;  %v359_v58 = vld [vmem:[%s1310_s2 + $0x78] sm:$0xff]  ;;  %v36_v59 = vld [vmem:[%s1308_s0 + $0xa8] sm:$0xff]  ;;  %v37_v61 = vld [vmem:[%s1308_s0 + $0xb0] sm:$0xff] }
  0x1e   :  { %719 = vmatprep.mubr.msk.f32.mxu0 %vm975_vm0, %v976_v6  ;;  %912 = vmatpush3.bf16.msra.mxu0 %v911_v24  ;;  %v926_v60 = vpack.c.bf16 %v359_v58, %v358_v57  ;;  %v38_v62 = vld [vmem:[%s1308_s0 + $0xb8] sm:$0xff]  ;;  %v39_v63 = vld [vmem:[%s1308_s0 + $0xc0] sm:$0xff]  ;;  %s977_s0 = smov [#allocation2]  }
  0x1f   :  { %913 = vmatprep.subr.bf16.mxu0 %v974_v3  ;;  %940 = vmatpush3.bf16.msra.mxu1 %v917_v32  ;;  %s580_s27 = sshll.u32 %s977_s0, 4  ;;  %s581_s27 = int_to_ptr.vmem [resolvable:$true] %s580_s27 }
  0x20   :  { %933 = vmatprep.subr.bf16.mxu1 %v974_v3  ;;  %s950_s28 = scalar_lea.vmem %s581_s27, 3200  ;;  %p955_p1 = scmp.lt.s32.totalorder %s581_s27, %s581_s27 }
  0x21   :  { %720 = vmatmul.mubr.msk.f32.gmra.mrb[6].mxu0 %vm49_vm2, %v18_v33  ;;  %p951_p0 = scmp.ne.s32.totalorder %s581_s27, %s950_s28  ;;  %p956_p2 = scmp.lt.s32.totalorder %s950_s28, %s950_s28 }
  0x22   :  { %722 = vmatprep.mubr.msk.f32.mxu0 %vm975_vm0, %v976_v6  ;;  %915 = vmatpush3.bf16.msra.mxu0 %v914_v28 }
  0x23   :  { %916 = vmatprep.subr.bf16.mxu0 %v974_v3  ;;  %941 = vmatpush3.bf16.msra.mxu1 %v920_v36  ;;  %p957_p3 = por %p956_p2, %p955_p1 }
  0x24   :  { %934 = vmatprep.subr.bf16.mxu1 %v974_v3 }
  0x25   :  { %723 = vmatmul.mubr.msk.f32.gmra.mrb[8].mxu0 %vm49_vm2, %v19_v37  ;;  %p958_p4 = pnand %p957_p3, %p951_p0 }
  0x26   :  { %725 = vmatprep.mubr.msk.f32.mxu0 %vm975_vm0, %v976_v6  ;;  %918 = vmatpush3.bf16.msra.mxu0 %v917_v32 }
  0x27   :  { %919 = vmatprep.subr.bf16.mxu0 %v974_v3  ;;  %942 = vmatpush3.bf16.msra.mxu1 %v923_v40 }
  0x28   :  { %935 = vmatprep.subr.bf16.mxu1 %v974_v3 }
  0x29   :  { %726 = vmatmul.mubr.msk.f32.gmra.mrb[10].mxu0 %vm49_vm2, %v20_v41 }
  0x2a   :  { %728 = vmatprep.mubr.msk.f32.mxu0 %vm975_vm0, %v976_v6  ;;  %921 = vmatpush3.bf16.msra.mxu0 %v920_v36 }
  0x2b   :  { %922 = vmatprep.subr.bf16.mxu0 %v974_v3  ;;  %943 = vmatpush3.bf16.msra.mxu1 %v926_v60 }
  0x2d   :  { %729 = vmatmul.mubr.msk.f32.gmra.mrb[12].mxu0 %vm49_vm2, %v21_v42 }
  0x2e   :  { %731 = vmatprep.mubr.msk.f32.mxu0 %vm975_vm0, %v976_v6  ;;  %924 = vmatpush3.bf16.msra.mxu0 %v923_v40 }
  0x2f   :  { %925 = vmatprep.subr.bf16.mxu0 %v974_v3 }
  0x31   :  { %732 = vmatmul.mubr.msk.f32.gmra.mrb[14].mxu0 %vm49_vm2, %v22_v43 }
  0x32   :  { %734 = vmatprep.mubr.msk.f32.mxu0 %vm975_vm0, %v976_v6  ;;  %927 = vmatpush3.bf16.msra.mxu0 %v926_v60 }
  0x35   :  { %735 = vmatmul.mubr.msk.f32.gmra.mrb[16].mxu0 %vm49_vm2, %v23_v44 }
  0x36   :  { %737 = vmatprep.mubr.msk.f32.mxu0 %vm975_vm0, %v976_v6 }
  0x39   :  { %738 = vmatmul.mubr.msk.f32.gmra.mrb[18].mxu0 %vm49_vm2, %v24_v45 }
  0x3a   :  { %740 = vmatprep.mubr.msk.f32.mxu0 %vm975_vm0, %v976_v6 }
  0x3d   :  { %741 = vmatmul.mubr.msk.f32.gmra.mrb[20].mxu0 %vm49_vm2, %v25_v46 }
  0x3e   :  { %743 = vmatprep.mubr.msk.f32.mxu0 %vm975_vm0, %v976_v6 }
  0x41   :  { %744 = vmatmul.mubr.msk.f32.gmra.mrb[22].mxu0 %vm49_vm2, %v26_v47 }
  0x42   :  { %746 = vmatprep.mubr.msk.f32.mxu0 %vm975_vm0, %v976_v6 }
  0x45   :  { %747 = vmatmul.mubr.msk.f32.gmra.mrb[24].mxu0 %vm49_vm2, %v27_v48 }
  0x46   :  { %749 = vmatprep.mubr.msk.f32.mxu0 %vm975_vm0, %v976_v6 }
  0x49   :  { %750 = vmatmul.mubr.msk.f32.gmra.mrb[26].mxu0 %vm49_vm2, %v28_v49 }
  0x4a   :  { %752 = vmatprep.mubr.msk.f32.mxu0 %vm975_vm0, %v976_v6 }
  0x4d   :  { %753 = vmatmul.mubr.msk.f32.gmra.mrb[28].mxu0 %vm49_vm2, %v29_v50 }
  0x4e   :  { %755 = vmatprep.mubr.msk.f32.mxu0 %vm975_vm0, %v976_v6 }
  0x51   :  { %756 = vmatmul.mubr.msk.f32.gmra.mrb[30].mxu0 %vm49_vm2, %v30_v51 }
  0x52   :  { %758 = vmatprep.mubr.msk.f32.mxu0 %vm975_vm0, %v976_v6 }
  0x55   :  { %759 = vmatmul.mubr.msk.f32.gmra.mrb[32].mxu0 %vm49_vm2, %v31_v52 }
  0x56   :  { %761 = vmatprep.mubr.msk.f32.mxu0 %vm975_vm0, %v976_v6 }
  0x59   :  { %762 = vmatmul.mubr.msk.f32.gmra.mrb[34].mxu0 %vm49_vm2, %v32_v53 }
  0x5a   :  { %764 = vmatprep.mubr.msk.f32.mxu0 %vm975_vm0, %v976_v6 }
  0x5d   :  { %765 = vmatmul.mubr.msk.f32.gmra.mrb[36].mxu0 %vm49_vm2, %v33_v54 }
  0x5e   :  { %767 = vmatprep.mubr.msk.f32.mxu0 %vm975_vm0, %v976_v6 }
  0x61   :  { %768 = vmatmul.mubr.msk.f32.gmra.mrb[38].mxu0 %vm49_vm2, %v34_v55 }
  0x62   :  { %770 = vmatprep.mubr.msk.f32.mxu0 %vm975_vm0, %v976_v6 }
  0x65   :  { %771 = vmatmul.mubr.msk.f32.gmra.mrb[40].mxu0 %vm49_vm2, %v35_v56 }
  0x66   :  { %773 = vmatprep.mubr.msk.f32.mxu0 %vm975_vm0, %v976_v6 }
  0x69   :  { %774 = vmatmul.mubr.msk.f32.gmra.mrb[42].mxu0 %vm49_vm2, %v36_v59 }
  0x6a   :  { %776 = vmatprep.mubr.msk.f32.mxu0 %vm975_vm0, %v976_v6 }
  0x6d   :  { %777 = vmatmul.mubr.msk.f32.gmra.mrb[44].mxu0 %vm49_vm2, %v37_v61 }
  0x6e   :  { %779 = vmatprep.mubr.msk.f32.mxu0 %vm975_vm0, %v976_v6 }
  0x71   :  { %780 = vmatmul.mubr.msk.f32.gmra.mrb[46].mxu0 %vm49_vm2, %v38_v62 }
  0x72   :  { %782 = vmatprep.mubr.msk.f32.mxu0 %vm975_vm0, %v976_v6 }
  0x75   :  { %783 = vmatmul.mubr.msk.f32.gmra.mrb[48].mxu0 %vm49_vm2, %v39_v63 }
  0x76   :  { %817 = vmatprep.mubr.msk.f32.mxu0 %vm975_vm0, %v976_v6 }
  0xe8   :  { %v195_v0 = vpop.f32.mrb[0].mxu0 }
  0xe9   :  { %v319_v1 = vmax.f32 %v195_v0, 0.0  ;;  %v712_v2 = vpop.f32.mrb[1].mxu0 }
  0xeb   :  { %818 = vmatmul.mubr.f32.vlgmr.msra.gmra.mrb[50].mxu0 %v319_v1 }
  0xec   :  { %v200_v3 = vpop.f32.mrb[2].mxu0 }
  0xed   :  { %v320_v4 = vmax.f32 %v200_v3, 0.0  ;;  %v715_v5 = vpop.f32.mrb[3].mxu0 }
  0xef   :  { %821 = vmatmul.mubr.f32.vlgmr.msra.gmra.mrb[0].mxu1 %v320_v4 }
  0xf0   :  { %v205_v7 = vpop.f32.mrb[4].mxu0  ;;  %823 = vmatprep.mubr.msk.f32.mxu1 %vm975_vm0, %v976_v6 }
  0xf1   :  { %v321_v8 = vmax.f32 %v205_v7, 0.0  ;;  %v718_v9 = vpop.f32.mrb[5].mxu0 }
  0xf3   :  { %824 = vmatmul.mubr.f32.gmra.mrb[2].mxu1 %v321_v8 }
  0xf4   :  { %v210_v10 = vpop.f32.mrb[6].mxu0  ;;  %826 = vmatprep.mubr.msk.f32.mxu1 %vm975_vm0, %v976_v6 }
  0xf5   :  { %v322_v11 = vmax.f32 %v210_v10, 0.0  ;;  %v721_v12 = vpop.f32.mrb[7].mxu0 }
  0xf7   :  { %827 = vmatmul.mubr.f32.gmra.mrb[4].mxu1 %v322_v11 }
  0xf8   :  { %v215_v13 = vpop.f32.mrb[8].mxu0  ;;  %829 = vmatprep.mubr.msk.f32.mxu1 %vm975_vm0, %v976_v6 }
  0xf9   :  { %v323_v14 = vmax.f32 %v215_v13, 0.0  ;;  %v724_v15 = vpop.f32.mrb[9].mxu0 }
  0xfb   :  { %830 = vmatmul.mubr.f32.gmra.mrb[6].mxu1 %v323_v14 }
  0xfc   :  { %v220_v16 = vpop.f32.mrb[10].mxu0  ;;  %832 = vmatprep.mubr.msk.f32.mxu1 %vm975_vm0, %v976_v6 }
  0xfd   :  { %v324_v17 = vmax.f32 %v220_v16, 0.0  ;;  %v727_v18 = vpop.f32.mrb[11].mxu0 }
  0xff   :  { %833 = vmatmul.mubr.f32.gmra.mrb[8].mxu1 %v324_v17 }
 0x100   :  { %v225_v19 = vpop.f32.mrb[12].mxu0  ;;  %835 = vmatprep.mubr.msk.f32.mxu1 %vm975_vm0, %v976_v6 }
 0x101   :  { %v325_v20 = vmax.f32 %v225_v19, 0.0  ;;  %v730_v21 = vpop.f32.mrb[13].mxu0 }
 0x103   :  { %836 = vmatmul.mubr.f32.gmra.mrb[10].mxu1 %v325_v20 }
 0x104   :  { %v230_v22 = vpop.f32.mrb[14].mxu0  ;;  %838 = vmatprep.mubr.msk.f32.mxu1 %vm975_vm0, %v976_v6 }
 0x105   :  { %v326_v23 = vmax.f32 %v230_v22, 0.0  ;;  %v733_v24 = vpop.f32.mrb[15].mxu0 }
 0x107   :  { %839 = vmatmul.mubr.f32.gmra.mrb[12].mxu1 %v326_v23 }
 0x108   :  { %v235_v25 = vpop.f32.mrb[16].mxu0  ;;  %841 = vmatprep.mubr.msk.f32.mxu1 %vm975_vm0, %v976_v6 }
 0x109   :  { %v327_v26 = vmax.f32 %v235_v25, 0.0  ;;  %v736_v27 = vpop.f32.mrb[17].mxu0 }
 0x10b   :  { %842 = vmatmul.mubr.f32.gmra.mrb[14].mxu1 %v327_v26 }
 0x10c   :  { %v240_v28 = vpop.f32.mrb[18].mxu0  ;;  %844 = vmatprep.mubr.msk.f32.mxu1 %vm975_vm0, %v976_v6 }
 0x10d   :  { %v328_v29 = vmax.f32 %v240_v28, 0.0  ;;  %v739_v30 = vpop.f32.mrb[19].mxu0 }
 0x10f   :  { %845 = vmatmul.mubr.f32.gmra.mrb[16].mxu1 %v328_v29 }
 0x110   :  { %v245_v31 = vpop.f32.mrb[20].mxu0  ;;  %847 = vmatprep.mubr.msk.f32.mxu1 %vm975_vm0, %v976_v6 }
 0x111   :  { %v329_v32 = vmax.f32 %v245_v31, 0.0  ;;  %v742_v33 = vpop.f32.mrb[21].mxu0 }
 0x113   :  { %848 = vmatmul.mubr.f32.gmra.mrb[18].mxu1 %v329_v32 }
 0x114   :  { %v250_v34 = vpop.f32.mrb[22].mxu0  ;;  %850 = vmatprep.mubr.msk.f32.mxu1 %vm975_vm0, %v976_v6 }
 0x115   :  { %v330_v35 = vmax.f32 %v250_v34, 0.0  ;;  %v745_v36 = vpop.f32.mrb[23].mxu0 }
 0x117   :  { %851 = vmatmul.mubr.f32.gmra.mrb[20].mxu1 %v330_v35 }
 0x118   :  { %v255_v37 = vpop.f32.mrb[24].mxu0  ;;  %853 = vmatprep.mubr.msk.f32.mxu1 %vm975_vm0, %v976_v6 }
 0x119   :  { %v331_v38 = vmax.f32 %v255_v37, 0.0  ;;  %v748_v39 = vpop.f32.mrb[25].mxu0 }
 0x11b   :  { %854 = vmatmul.mubr.f32.gmra.mrb[22].mxu1 %v331_v38 }
 0x11c   :  { %v260_v40 = vpop.f32.mrb[26].mxu0  ;;  %856 = vmatprep.mubr.msk.f32.mxu1 %vm975_vm0, %v976_v6 }
 0x11d   :  { %v332_v41 = vmax.f32 %v260_v40, 0.0  ;;  %v751_v42 = vpop.f32.mrb[27].mxu0 }
 0x11f   :  { %857 = vmatmul.mubr.f32.gmra.mrb[24].mxu1 %v332_v41 }
 0x120   :  { %v265_v43 = vpop.f32.mrb[28].mxu0  ;;  %859 = vmatprep.mubr.msk.f32.mxu1 %vm975_vm0, %v976_v6 }
 0x121   :  { %v333_v44 = vmax.f32 %v265_v43, 0.0  ;;  %v754_v45 = vpop.f32.mrb[29].mxu0 }
 0x123   :  { %860 = vmatmul.mubr.f32.gmra.mrb[26].mxu1 %v333_v44 }
 0x124   :  { %v270_v46 = vpop.f32.mrb[30].mxu0  ;;  %862 = vmatprep.mubr.msk.f32.mxu1 %vm975_vm0, %v976_v6 }
 0x125   :  { %v334_v47 = vmax.f32 %v270_v46, 0.0  ;;  %v757_v48 = vpop.f32.mrb[31].mxu0 }
 0x127   :  { %863 = vmatmul.mubr.f32.gmra.mrb[28].mxu1 %v334_v47 }
 0x128   :  { %v275_v49 = vpop.f32.mrb[32].mxu0  ;;  %865 = vmatprep.mubr.msk.f32.mxu1 %vm975_vm0, %v976_v6 }
 0x129   :  { %v335_v50 = vmax.f32 %v275_v49, 0.0  ;;  %v760_v51 = vpop.f32.mrb[33].mxu0 }
 0x12b   :  { %866 = vmatmul.mubr.f32.gmra.mrb[30].mxu1 %v335_v50 }
 0x12c   :  { %v280_v52 = vpop.f32.mrb[34].mxu0  ;;  %868 = vmatprep.mubr.msk.f32.mxu1 %vm975_vm0, %v976_v6 }
 0x12d   :  { %v336_v53 = vmax.f32 %v280_v52, 0.0  ;;  %v763_v54 = vpop.f32.mrb[35].mxu0 }
 0x12f   :  { %869 = vmatmul.mubr.f32.gmra.mrb[32].mxu1 %v336_v53 }
 0x130   :  { %v285_v55 = vpop.f32.mrb[36].mxu0  ;;  %871 = vmatprep.mubr.msk.f32.mxu1 %vm975_vm0, %v976_v6 }
 0x131   :  { %v337_v56 = vmax.f32 %v285_v55, 0.0  ;;  %v766_v57 = vpop.f32.mrb[37].mxu0 }
 0x133   :  { %872 = vmatmul.mubr.f32.gmra.mrb[34].mxu1 %v337_v56 }
 0x134   :  { %v290_v58 = vpop.f32.mrb[38].mxu0  ;;  %874 = vmatprep.mubr.msk.f32.mxu1 %vm975_vm0, %v976_v6 }
 0x135   :  { %v338_v59 = vmax.f32 %v290_v58, 0.0  ;;  %v769_v60 = vpop.f32.mrb[39].mxu0 }
 0x137   :  { %875 = vmatmul.mubr.f32.gmra.mrb[36].mxu1 %v338_v59 }
 0x138   :  { %v295_v61 = vpop.f32.mrb[40].mxu0  ;;  %877 = vmatprep.mubr.msk.f32.mxu1 %vm975_vm0, %v976_v6 }
 0x139   :  { %v339_v62 = vmax.f32 %v295_v61, 0.0  ;;  %v772_v63 = vpop.f32.mrb[41].mxu0 }
 0x13b   :  { %878 = vmatmul.mubr.f32.gmra.mrb[38].mxu1 %v339_v62 }
 0x13c   :  { %v300_v0 = vpop.f32.mrb[42].mxu0  ;;  %880 = vmatprep.mubr.msk.f32.mxu1 %vm975_vm0, %v976_v6 }
 0x13d   :  { %v340_v1 = vmax.f32 %v300_v0, 0.0  ;;  %v775_v2 = vpop.f32.mrb[43].mxu0 }
 0x13f   :  { %881 = vmatmul.mubr.f32.gmra.mrb[40].mxu1 %v340_v1 }
 0x140   :  { %v305_v3 = vpop.f32.mrb[44].mxu0  ;;  %883 = vmatprep.mubr.msk.f32.mxu1 %vm975_vm0, %v976_v6 }
 0x141   :  { %v341_v4 = vmax.f32 %v305_v3, 0.0  ;;  %v778_v5 = vpop.f32.mrb[45].mxu0 }
 0x143   :  { %884 = vmatmul.mubr.f32.gmra.mrb[42].mxu1 %v341_v4 }
 0x144   :  { %v310_v7 = vpop.f32.mrb[46].mxu0  ;;  %886 = vmatprep.mubr.msk.f32.mxu1 %vm975_vm0, %v976_v6 }
 0x145   :  { %v342_v8 = vmax.f32 %v310_v7, 0.0  ;;  %v781_v9 = vpop.f32.mrb[47].mxu0 }
 0x147   :  { %887 = vmatmul.mubr.f32.gmra.mrb[44].mxu1 %v342_v8 }
 0x148   :  { %v315_v10 = vpop.f32.mrb[48].mxu0  ;;  %889 = vmatprep.mubr.msk.f32.mxu1 %vm975_vm0, %v976_v6 }
 0x149   :  { %v343_v11 = vmax.f32 %v315_v10, 0.0  ;;  %v784_v12 = vpop.f32.mrb[49].mxu0 }
 0x14b   :  { %890 = vmatmul.mubr.f32.gmra.mrb[46].mxu1 %v343_v11 }
 0x1be   :  { %v426_v13 = vpop.f32.mrb[50].mxu0 }
 0x1bf   :  { %550 = vst [vmem:[#allocation2] sm:$0xff] %v426_v13  ;;  %v819_v14 = vpop.f32.mrb[51].mxu0 }
 0x1c2   :  { %v431_v15 = vpop.f32.mrb[0].mxu1 }
 0x1c3   :  { %551 = vst [vmem:[#allocation2 + $0x8] sm:$0xff] %v431_v15  ;;  %v822_v16 = vpop.f32.mrb[1].mxu1 }
 0x1c6   :  { %v436_v17 = vpop.f32.mrb[2].mxu1 }
 0x1c7   :  { %552 = vst [vmem:[#allocation2 + $0x10] sm:$0xff] %v436_v17  ;;  %v825_v18 = vpop.f32.mrb[3].mxu1 }
 0x1ca   :  { %v441_v19 = vpop.f32.mrb[4].mxu1 }
 0x1cb   :  { %553 = vst [vmem:[#allocation2 + $0x18] sm:$0xff] %v441_v19  ;;  %v828_v20 = vpop.f32.mrb[5].mxu1 }
 0x1ce   :  { %v446_v21 = vpop.f32.mrb[6].mxu1 }
 0x1cf   :  { %554 = vst [vmem:[#allocation2 + $0x20] sm:$0xff] %v446_v21  ;;  %v831_v22 = vpop.f32.mrb[7].mxu1 }
 0x1d2   :  { %v451_v23 = vpop.f32.mrb[8].mxu1 }
 0x1d3   :  { %555 = vst [vmem:[#allocation2 + $0x28] sm:$0xff] %v451_v23  ;;  %v834_v6 = vpop.f32.mrb[9].mxu1 }
 0x1d6   :  { %v456_v24 = vpop.f32.mrb[10].mxu1 }
 0x1d7   :  { %556 = vst [vmem:[#allocation2 + $0x30] sm:$0xff] %v456_v24  ;;  %v837_v25 = vpop.f32.mrb[11].mxu1 }
 0x1da   :  { %v461_v26 = vpop.f32.mrb[12].mxu1 }
 0x1db   :  { %557 = vst [vmem:[#allocation2 + $0x38] sm:$0xff] %v461_v26  ;;  %v840_v27 = vpop.f32.mrb[13].mxu1 }
 0x1de   :  { %v466_v28 = vpop.f32.mrb[14].mxu1 }
 0x1df   :  { %558 = vst [vmem:[#allocation2 + $0x40] sm:$0xff] %v466_v28  ;;  %v843_v29 = vpop.f32.mrb[15].mxu1 }
 0x1e2   :  { %v471_v30 = vpop.f32.mrb[16].mxu1 }
 0x1e3   :  { %559 = vst [vmem:[#allocation2 + $0x48] sm:$0xff] %v471_v30  ;;  %v846_v31 = vpop.f32.mrb[17].mxu1 }
 0x1e6   :  { %v476_v32 = vpop.f32.mrb[18].mxu1 }
 0x1e7   :  { %560 = vst [vmem:[#allocation2 + $0x50] sm:$0xff] %v476_v32  ;;  %v849_v33 = vpop.f32.mrb[19].mxu1 }
 0x1ea   :  { %v481_v34 = vpop.f32.mrb[20].mxu1 }
 0x1eb   :  { %561 = vst [vmem:[#allocation2 + $0x58] sm:$0xff] %v481_v34  ;;  %v852_v35 = vpop.f32.mrb[21].mxu1 }
 0x1ee   :  { %v486_v36 = vpop.f32.mrb[22].mxu1 }
 0x1ef   :  { %562 = vst [vmem:[#allocation2 + $0x60] sm:$0xff] %v486_v36  ;;  %v855_v37 = vpop.f32.mrb[23].mxu1 }
 0x1f2   :  { %v491_v38 = vpop.f32.mrb[24].mxu1 }
 0x1f3   :  { %563 = vst [vmem:[#allocation2 + $0x68] sm:$0xff] %v491_v38  ;;  %v858_v39 = vpop.f32.mrb[25].mxu1 }
 0x1f6   :  { %v496_v40 = vpop.f32.mrb[26].mxu1 }
 0x1f7   :  { %564 = vst [vmem:[#allocation2 + $0x70] sm:$0xff] %v496_v40  ;;  %v861_v41 = vpop.f32.mrb[27].mxu1 }
 0x1fa   :  { %v501_v42 = vpop.f32.mrb[28].mxu1 }
 0x1fb   :  { %565 = vst [vmem:[#allocation2 + $0x78] sm:$0xff] %v501_v42  ;;  %v864_v43 = vpop.f32.mrb[29].mxu1 }
 0x1fe   :  { %v506_v44 = vpop.f32.mrb[30].mxu1 }
 0x1ff   :  { %566 = vst [vmem:[#allocation2 + $0x80] sm:$0xff] %v506_v44  ;;  %v867_v45 = vpop.f32.mrb[31].mxu1 }
 0x202   :  { %v511_v46 = vpop.f32.mrb[32].mxu1 }
 0x203   :  { %567 = vst [vmem:[#allocation2 + $0x88] sm:$0xff] %v511_v46  ;;  %v870_v47 = vpop.f32.mrb[33].mxu1 }
 0x206   :  { %v516_v48 = vpop.f32.mrb[34].mxu1 }
 0x207   :  { %568 = vst [vmem:[#allocation2 + $0x90] sm:$0xff] %v516_v48  ;;  %v873_v49 = vpop.f32.mrb[35].mxu1 }
 0x20a   :  { %v521_v50 = vpop.f32.mrb[36].mxu1 }
 0x20b   :  { %569 = vst [vmem:[#allocation2 + $0x98] sm:$0xff] %v521_v50  ;;  %v876_v51 = vpop.f32.mrb[37].mxu1 }
 0x20e   :  { %v526_v52 = vpop.f32.mrb[38].mxu1 }
 0x20f   :  { %570 = vst [vmem:[#allocation2 + $0xa0] sm:$0xff] %v526_v52  ;;  %v879_v53 = vpop.f32.mrb[39].mxu1 }
 0x212   :  { %v531_v54 = vpop.f32.mrb[40].mxu1 }
 0x213   :  { %571 = vst [vmem:[#allocation2 + $0xa8] sm:$0xff] %v531_v54  ;;  %v882_v55 = vpop.f32.mrb[41].mxu1 }
 0x216   :  { %v536_v56 = vpop.f32.mrb[42].mxu1 }
 0x217   :  { %572 = vst [vmem:[#allocation2 + $0xb0] sm:$0xff] %v536_v56  ;;  %v885_v57 = vpop.f32.mrb[43].mxu1 }
 0x21a   :  { %v541_v58 = vpop.f32.mrb[44].mxu1 }
 0x21b   :  { %573 = vst [vmem:[#allocation2 + $0xb8] sm:$0xff] %v541_v58  ;;  %v888_v59 = vpop.f32.mrb[45].mxu1 }
 0x21e   :  { %v546_v60 = vpop.f32.mrb[46].mxu1 }
 0x21f   :  { %574 = vst [vmem:[#allocation2 + $0xc0] sm:$0xff] %v546_v60  ;;  %v891_v61 = vpop.f32.mrb[47].mxu1 }
 0x220   :  { %961 = shalt.err (!%p958_p4)
}
 0x221   :  { %s962_s4 = scalar_lea.hbm %s1311_s3, 3200 }
 0x222   :  { %p963_p5 = scmp.ne.s32.totalorder %s1311_s3, %s962_s4  ;;  %p966_p6 = scmp.lt.u32.totalorder %s962_s4, %s1311_s3 }
 0x224   :  { %p968_p7 = pnand %p966_p6, %p963_p5 }
 0x226   :  { %971 = shalt.err (!%p968_p7)
}
 0x227   :  { %s978_s9 = smov 128   ;;  %s979_s10 = smov 8  }
 0x228   :  { %586 = dma.vmem_to_hbm [thread:$0]  %s581_s27, 3200, %s1311_s3, [#allocation3], %s978_s9, %s978_s9, %s979_s10  }
 0x229   :  { %972 = dma.done.wait [#allocation3], 3200  }
 0x22a   :  { %973 = vsyncadd [#allocation3], 4294964096 }
 0x22b   :  { %590 = vsyncpa [#allocation3], 1 }

</bundles_post_ra>
